<compile_context>
chip_gen: v7x
topology: tpu7x:2x2x1
jax: 0.10.0
libtpu: 0.0.40
codegen_flags: <defaults>
</compile_context>

<pallas_src>
import functools

import jax
import jax.numpy as jnp
from jax import lax
from jax.experimental import pallas as pl
from jax.experimental.pallas import tpu as pltpu


def _decomp_kernel(t_pad, lens_ref, x_ref, w_ref, b_ref, season_ref, trend_ref):
    """One enc_out_list entry per grid step; batch folded into the block.

    t_pad:      static python int, padded time length (power of two)
    lens_ref:   (N,) SMEM, true sequence length per entry (scalar prefetch)
    x_ref:      (1, M, Cp) VMEM, M = B * t_pad, zero padded in t and c
    w_ref:      (3, Cp, Cp) conv taps; w_ref[k][ci, co] = weight[co, ci, k]
                (k=0: x[t-1], k=1: x[t], k=2: x[t+1])
    b_ref:      (1, Cp)   conv bias (zero padded)
    season_ref: (1, M, Cp) output: x - trend
    trend_ref:  (1, M, Cp) output: avg_pool(conv1d(x))
    """
    i = pl.program_id(0)
    length = lens_ref[i]                          # true T of this entry

    x = x_ref[0]                                  # (M, Cp) f32
    m, cp = x.shape

    # Per-row time index within its batch element (t_pad is a power of two).
    # (M, 1) masks; broadcast across lanes inside the selects.
    row = lax.broadcasted_iota(jnp.int32, (m, 1), 0)
    t_idx = jnp.bitwise_and(row, t_pad - 1)

    first = t_idx == 0                            # row 0 of each batch element
    last = t_idx == (t_pad - 1)                   # last row of each batch element
    valid = t_idx < length                        # rows inside the true sequence

    # Zero-padded time shifts (Conv1d padding=1): XLU rolls + VPU selects.
    x_prev = jnp.where(first, 0.0, pltpu.roll(x, shift=1, axis=0))
    x_next = jnp.where(last, 0.0, pltpu.roll(x, shift=m - 1, axis=0))

    # 3-tap conv as three accumulating MXU passes, f32 accumulation.
    conv = jnp.dot(x, w_ref[1], preferred_element_type=jnp.float32)
    conv = conv + jnp.dot(x_prev, w_ref[0], preferred_element_type=jnp.float32)
    conv = conv + jnp.dot(x_next, w_ref[2], preferred_element_type=jnp.float32)
    conv = conv + b_ref[...]
    # Zero conv rows past the true length so the pool sees zero padding there
    # (matches AvgPool1d's zero padding of the length-T conv output).
    conv = jnp.where(valid, conv, 0.0)

    # AvgPool1d(k=3, stride=1, pad=1, count_include_pad=True): divisor is 3.
    c_prev = jnp.where(first, 0.0, pltpu.roll(conv, shift=1, axis=0))
    c_next = jnp.where(last, 0.0, pltpu.roll(conv, shift=m - 1, axis=0))
    trend = (c_prev + conv + c_next) * (1.0 / 3.0)

    season_ref[0] = (x - trend).astype(season_ref.dtype)
    trend_ref[0] = trend.astype(trend_ref.dtype)


@jax.jit
def _decompose_stacked(x_stacked, lens, w_taps, bias2d):
    """x_stacked: (N, B, T_pad, C_pad) f32. Returns (season, trend) same shape."""
    n, b, t_pad, c_pad = x_stacked.shape
    m = b * t_pad
    x_flat = x_stacked.reshape(n, m, c_pad)       # free reshape in XLA

    kernel = functools.partial(_decomp_kernel, t_pad)
    season, trend = pl.pallas_call(
        kernel,
        out_shape=(
            jax.ShapeDtypeStruct((n, m, c_pad), x_stacked.dtype),
            jax.ShapeDtypeStruct((n, m, c_pad), x_stacked.dtype),
        ),
        grid_spec=pltpu.PrefetchScalarGridSpec(
            num_scalar_prefetch=1,
            grid=(n,),
            in_specs=[
                pl.BlockSpec((1, m, c_pad), lambda i, lens: (i, 0, 0)),
                pl.BlockSpec((3, c_pad, c_pad), lambda i, lens: (0, 0, 0)),
                pl.BlockSpec((1, c_pad), lambda i, lens: (0, 0)),
            ],
            out_specs=(
                pl.BlockSpec((1, m, c_pad), lambda i, lens: (i, 0, 0)),
                pl.BlockSpec((1, m, c_pad), lambda i, lens: (i, 0, 0)),
            ),
        ),
        compiler_params=pltpu.CompilerParams(
            dimension_semantics=("parallel",)),   # v7x: entries split over 2 TCs
    )(lens, x_flat, w_taps, bias2d)
    return (season.reshape(n, b, t_pad, c_pad),
            trend.reshape(n, b, t_pad, c_pad))


def adaptive_decomp_forward(enc_out_list, trend_weight, trend_bias):
    """Mirror of AdaptiveDecomp.forward.

    enc_out_list: list of (b, T_i, c) arrays, c == d_model (b, c shared).
    trend_weight: (c, c, 3)  -- PyTorch Conv1d weight layout (out, in, k)
    trend_bias:   (c,)
    Returns (x_kan_list, season_list, trend_list), each entry shaped (b*c, T_i).
    """
    c = trend_weight.shape[0]
    b = enc_out_list[0].shape[0]
    ts = [int(x.shape[1]) for x in enc_out_list]
    for x in enc_out_list:
        assert x.shape[0] == b and x.shape[2] == c

    # Lane-dense channel padding; power-of-two time padding (for the cheap
    # bitwise time-index mask in the kernel).
    c_pad = ((c + 127) // 128) * 128
    t_pad = max(8, pl.next_power_of_2(max(ts)))

    # Pad & stack inputs: (N, B, T_pad, C_pad).
    x_stacked = jnp.stack([
        jnp.pad(x.astype(jnp.float32),
                ((0, 0), (0, t_pad - x.shape[1]), (0, c_pad - c)))
        for x in enc_out_list
    ], axis=0)
    lens = jnp.asarray(ts, dtype=jnp.int32)

    # Padded per-tap weights: w_taps[k, ci, co] = weight[co, ci, k].
    wk = jnp.transpose(trend_weight, (2, 1, 0)).astype(jnp.float32)   # (3, c, c)
    w_taps = jnp.pad(wk, ((0, 0), (0, c_pad - c), (0, c_pad - c)))    # (3, Cp, Cp)
    bias2d = jnp.pad(trend_bias.astype(jnp.float32),
                     (0, c_pad - c)).reshape(1, c_pad)

    season_s, trend_s = _decompose_stacked(x_stacked, lens, w_taps, bias2d)

    x_kan_list, season_list, trend_list = [], [], []
    for i, x in enumerate(enc_out_list):
        t_i = ts[i]
        s = season_s[i, :, :t_i, :c]
        t = trend_s[i, :, :t_i, :c]
        # x.permute(0,2,1).reshape(-1, T) — plain-XLA glue (lane dim T too small
        # to be worth emitting from the kernel).
        x_kan_list.append(jnp.transpose(x, (0, 2, 1)).reshape(-1, t_i))
        season_list.append(jnp.transpose(s, (0, 2, 1)).reshape(-1, t_i))
        trend_list.append(jnp.transpose(t, (0, 2, 1)).reshape(-1, t_i))
    return x_kan_list, season_list, trend_list


def _reference_decompose(x, weight, bias):
    """Pure-JAX reference (lax.conv) matching PyTorch semantics, for checking."""
    x_ncw = jnp.transpose(x, (0, 2, 1))           # (b, c, T)
    conv = lax.conv_general_dilated(
        x_ncw, weight, window_strides=(1,), padding=[(1, 1)],
        dimension_numbers=("NCH", "OIH", "NCH"),
    ) + bias[None, :, None]
    cp = jnp.pad(conv, ((0, 0), (0, 0), (1, 1)))
    trend = (cp[:, :, :-2] + cp[:, :, 1:-1] + cp[:, :, 2:]) / 3.0
    season = x_ncw - trend
    return jnp.transpose(season, (0, 2, 1)), jnp.transpose(trend, (0, 2, 1))


if __name__ == "__main__":
    key = jax.random.PRNGKey(0)
    k_w, k_b, k_x1, k_x2 = jax.random.split(key, 4)

    d_model = 32          # configs.d_model
    batch = 2

    # Deterministic "trend_conv" parameters (PyTorch layout: (out, in, k)).
    trend_weight = jax.random.normal(k_w, (d_model, d_model, 3), jnp.float32) * 0.1
    trend_bias = jax.random.normal(k_b, (d_model,), jnp.float32) * 0.1

    # enc_out_list: list of (b, T, c) encoder outputs with different seq lens.
    x1 = jax.random.normal(k_x1, (batch, 8, d_model), jnp.float32)
    x2 = jax.random.normal(k_x2, (batch, 16, d_model), jnp.float32)
    enc_out_list = [x1, x2]

    x_kan_list, season_list, trend_list = adaptive_decomp_forward(
        enc_out_list, trend_weight, trend_bias
    )
    for arr in x_kan_list + season_list + trend_list:
        jax.block_until_ready(arr)

    # Correctness check against a pure-JAX reference of the PyTorch math.
    for x, xk_out, s_out, t_out in zip(enc_out_list, x_kan_list, season_list,
                                       trend_list):
        b, T, c = x.shape
        s_ref, t_ref = _reference_decompose(x, trend_weight, trend_bias)
        s_ref = jnp.transpose(s_ref, (0, 2, 1)).reshape(-1, T)
        t_ref = jnp.transpose(t_ref, (0, 2, 1)).reshape(-1, T)
        x_ref = jnp.transpose(x, (0, 2, 1)).reshape(-1, T)
        assert xk_out.shape == (b * c, T)
        assert s_out.shape == (b * c, T) and t_out.shape == (b * c, T)
        assert jnp.allclose(xk_out, x_ref)
        assert jnp.allclose(s_out, s_ref, atol=1e-4, rtol=1e-4)
        assert jnp.allclose(t_out, t_ref, atol=1e-4, rtol=1e-4)

    print("KERNEL_OK")
</pallas_src>

<mosaic_0001>
module attributes {stable_mosaic.version = 11 : i64} {
  func.func @_decomp_kernel(%arg0: i32, %arg1: memref<2xi32, #tpu.memory_space<smem>>, %arg2: memref<1x32x128xf32, #tpu.memory_space<vmem>>, %arg3: memref<3x128x128xf32, #tpu.memory_space<vmem>>, %arg4: memref<1x128xf32, #tpu.memory_space<vmem>>, %arg5: memref<1x32x128xf32, #tpu.memory_space<vmem>>, %arg6: memref<1x32x128xf32, #tpu.memory_space<vmem>>) attributes {dimension_semantics = [#tpu.dimension_semantics<parallel>], iteration_bounds = array<i64: 2>, scalar_prefetch = 1 : i64, scratch_operands = 0 : i64, tpu.core_type = #tpu.core_type<tc>, window_params = [{transform_indices = @transform_0, window_bounds = array<i64: 1, 32, 128>}, {pipeline_mode = #tpu.pipeline_mode<synchronous>, transform_indices = @transform_1, window_bounds = array<i64: 3, 128, 128>}, {pipeline_mode = #tpu.pipeline_mode<synchronous>, transform_indices = @transform_2, window_bounds = array<i64: 1, 128>}, {transform_indices = @transform_3, window_bounds = array<i64: 1, 32, 128>}, {transform_indices = @transform_4, window_bounds = array<i64: 1, 32, 128>}]} {
    %0 = arith.index_cast %arg0 : i32 to index
    %1 = memref.load %arg1[%0] : memref<2xi32, #tpu.memory_space<smem>>
    %c0 = arith.constant 0 : index
    %c0_0 = arith.constant 0 : index
    %c0_1 = arith.constant 0 : index
    %2 = vector.load %arg2[%c0, %c0_0, %c0_1] : memref<1x32x128xf32, #tpu.memory_space<vmem>>, vector<1x32x128xf32>
    %3 = vector.shape_cast %2 : vector<1x32x128xf32> to vector<32x128xf32>
    %4 = tpu.iota {dimensions = array<i32: 0>} : vector<32x1xi32>
    %c15_i32 = arith.constant 15 : i32
    %5 = vector.broadcast %c15_i32 : i32 to vector<32x1xi32>
    %6 = arith.andi %4, %5 : vector<32x1xi32>
    %c0_i32 = arith.constant 0 : i32
    %7 = vector.broadcast %c0_i32 : i32 to vector<32x1xi32>
    %8 = arith.cmpi eq, %6, %7 : vector<32x1xi32>
    %c15_i32_2 = arith.constant 15 : i32
    %9 = vector.broadcast %c15_i32_2 : i32 to vector<32x1xi32>
    %10 = arith.cmpi eq, %6, %9 : vector<32x1xi32>
    %11 = vector.broadcast %1 : i32 to vector<32x1xi32>
    %12 = arith.cmpi slt, %6, %11 : vector<32x1xi32>
    %c1_i32 = arith.constant 1 : i32
    %13 = tpu.dynamic_rotate %3 by %c1_i32 dim 0 : vector<32x128xf32>, i32 -> vector<32x128xf32>
    %cst = arith.constant 0.000000e+00 : f32
    %14 = vector.shape_cast %8 : vector<32x1xi1> to vector<32x1xi1>
    %15 = vector.broadcast %14 : vector<32x1xi1> to vector<32x128xi1>
    %16 = vector.broadcast %cst : f32 to vector<32x128xf32>
    %17 = arith.select %15, %16, %13 : vector<32x128xi1>, vector<32x128xf32>
    %c31_i32 = arith.constant 31 : i32
    %18 = tpu.dynamic_rotate %3 by %c31_i32 dim 0 : vector<32x128xf32>, i32 -> vector<32x128xf32>
    %cst_3 = arith.constant 0.000000e+00 : f32
    %19 = vector.shape_cast %10 : vector<32x1xi1> to vector<32x1xi1>
    %20 = vector.broadcast %19 : vector<32x1xi1> to vector<32x128xi1>
    %21 = vector.broadcast %cst_3 : f32 to vector<32x128xf32>
    %22 = arith.select %20, %21, %18 : vector<32x128xi1>, vector<32x128xf32>
    %c1 = arith.constant 1 : index
    %c0_4 = arith.constant 0 : index
    %c0_5 = arith.constant 0 : index
    %23 = vector.load %arg3[%c1, %c0_4, %c0_5] : memref<3x128x128xf32, #tpu.memory_space<vmem>>, vector<1x128x128xf32>
    %24 = vector.shape_cast %23 : vector<1x128x128xf32> to vector<128x128xf32>
    %cst_6 = arith.constant dense<0.000000e+00> : vector<32x128xf32>
    %25 = tpu.matmul %3, %24, %cst_6 {dimension_numbers = #tpu.dot_dimension_numbers<[1], [0], [0], [1], [0, 0, 1, 1], [], []>} : vector<32x128xf32>, vector<128x128xf32>, vector<32x128xf32> -> vector<32x128xf32>
    %c0_7 = arith.constant 0 : index
    %c0_8 = arith.constant 0 : index
    %c0_9 = arith.constant 0 : index
    %26 = vector.load %arg3[%c0_7, %c0_8, %c0_9] : memref<3x128x128xf32, #tpu.memory_space<vmem>>, vector<1x128x128xf32>
    %27 = vector.shape_cast %26 : vector<1x128x128xf32> to vector<128x128xf32>
    %cst_10 = arith.constant dense<0.000000e+00> : vector<32x128xf32>
    %28 = tpu.matmul %17, %27, %cst_10 {dimension_numbers = #tpu.dot_dimension_numbers<[1], [0], [0], [1], [0, 0, 1, 1], [], []>} : vector<32x128xf32>, vector<128x128xf32>, vector<32x128xf32> -> vector<32x128xf32>
    %29 = arith.addf %25, %28 : vector<32x128xf32>
    %c2 = arith.constant 2 : index
    %c0_11 = arith.constant 0 : index
    %c0_12 = arith.constant 0 : index
    %30 = vector.load %arg3[%c2, %c0_11, %c0_12] : memref<3x128x128xf32, #tpu.memory_space<vmem>>, vector<1x128x128xf32>
    %31 = vector.shape_cast %30 : vector<1x128x128xf32> to vector<128x128xf32>
    %cst_13 = arith.constant dense<0.000000e+00> : vector<32x128xf32>
    %32 = tpu.matmul %22, %31, %cst_13 {dimension_numbers = #tpu.dot_dimension_numbers<[1], [0], [0], [1], [0, 0, 1, 1], [], []>} : vector<32x128xf32>, vector<128x128xf32>, vector<32x128xf32> -> vector<32x128xf32>
    %33 = arith.addf %29, %32 : vector<32x128xf32>
    %c0_14 = arith.constant 0 : index
    %c0_15 = arith.constant 0 : index
    %34 = vector.load %arg4[%c0_14, %c0_15] : memref<1x128xf32, #tpu.memory_space<vmem>>, vector<1x128xf32>
    %35 = vector.broadcast %34 : vector<1x128xf32> to vector<32x128xf32>
    %36 = arith.addf %33, %35 : vector<32x128xf32>
    %cst_16 = arith.constant 0.000000e+00 : f32
    %37 = vector.shape_cast %12 : vector<32x1xi1> to vector<32x1xi1>
    %38 = vector.broadcast %37 : vector<32x1xi1> to vector<32x128xi1>
    %39 = vector.broadcast %cst_16 : f32 to vector<32x128xf32>
    %40 = arith.select %38, %36, %39 : vector<32x128xi1>, vector<32x128xf32>
    %c1_i32_17 = arith.constant 1 : i32
    %41 = tpu.dynamic_rotate %40 by %c1_i32_17 dim 0 : vector<32x128xf32>, i32 -> vector<32x128xf32>
    %cst_18 = arith.constant 0.000000e+00 : f32
    %42 = vector.shape_cast %8 : vector<32x1xi1> to vector<32x1xi1>
    %43 = vector.broadcast %42 : vector<32x1xi1> to vector<32x128xi1>
    %44 = vector.broadcast %cst_18 : f32 to vector<32x128xf32>
    %45 = arith.select %43, %44, %41 : vector<32x128xi1>, vector<32x128xf32>
    %c31_i32_19 = arith.constant 31 : i32
    %46 = tpu.dynamic_rotate %40 by %c31_i32_19 dim 0 : vector<32x128xf32>, i32 -> vector<32x128xf32>
    %cst_20 = arith.constant 0.000000e+00 : f32
    %47 = vector.shape_cast %10 : vector<32x1xi1> to vector<32x1xi1>
    %48 = vector.broadcast %47 : vector<32x1xi1> to vector<32x128xi1>
    %49 = vector.broadcast %cst_20 : f32 to vector<32x128xf32>
    %50 = arith.select %48, %49, %46 : vector<32x128xi1>, vector<32x128xf32>
    %51 = arith.addf %45, %40 : vector<32x128xf32>
    %52 = arith.addf %51, %50 : vector<32x128xf32>
    %cst_21 = arith.constant 0.333333343 : f32
    %53 = vector.broadcast %cst_21 : f32 to vector<32x128xf32>
    %54 = arith.mulf %52, %53 : vector<32x128xf32>
    %55 = arith.subf %3, %54 : vector<32x128xf32>
    %c0_22 = arith.constant 0 : index
    %c0_23 = arith.constant 0 : index
    %c0_24 = arith.constant 0 : index
    %56 = vector.load %arg5[%c0_22, %c0_23, %c0_24] : memref<1x32x128xf32, #tpu.memory_space<vmem>>, vector<1x32x128xf32>
    %57 = vector.shape_cast %56 : vector<1x32x128xf32> to vector<32x128xf32>
    %58 = vector.shape_cast %55 : vector<32x128xf32> to vector<1x32x128xf32>
    tpu.vector_store %arg5[%c0_22, %c0_23, %c0_24], %58 {strides = array<i32>} : memref<1x32x128xf32, #tpu.memory_space<vmem>>, vector<1x32x128xf32>,
    %c0_25 = arith.constant 0 : index
    %c0_26 = arith.constant 0 : index
    %c0_27 = arith.constant 0 : index
    %59 = vector.load %arg6[%c0_25, %c0_26, %c0_27] : memref<1x32x128xf32, #tpu.memory_space<vmem>>, vector<1x32x128xf32>
    %60 = vector.shape_cast %59 : vector<1x32x128xf32> to vector<32x128xf32>
    %61 = vector.shape_cast %54 : vector<32x128xf32> to vector<1x32x128xf32>
    tpu.vector_store %arg6[%c0_25, %c0_26, %c0_27], %61 {strides = array<i32>} : memref<1x32x128xf32, #tpu.memory_space<vmem>>, vector<1x32x128xf32>,
    return
  }
  func.func @transform_0(%arg0: i32, %arg1: memref<2xi32, #tpu.memory_space<smem>>) -> (i32, i32, i32) {
    %c0_i32 = arith.constant 0 : i32
    %c0_i32_0 = arith.constant 0 : i32
    %c0_i32_1 = arith.constant 0 : i32
    return %arg0, %c0_i32, %c0_i32_0 : i32, i32, i32
  }
  func.func @transform_1(%arg0: i32, %arg1: memref<2xi32, #tpu.memory_space<smem>>) -> (i32, i32, i32) {
    %c0_i32 = arith.constant 0 : i32
    %c0_i32_0 = arith.constant 0 : i32
    %c0_i32_1 = arith.constant 0 : i32
    %c0_i32_2 = arith.constant 0 : i32
    return %c0_i32, %c0_i32_0, %c0_i32_1 : i32, i32, i32
  }
  func.func @transform_2(%arg0: i32, %arg1: memref<2xi32, #tpu.memory_space<smem>>) -> (i32, i32) {
    %c0_i32 = arith.constant 0 : i32
    %c0_i32_0 = arith.constant 0 : i32
    %c0_i32_1 = arith.constant 0 : i32
    return %c0_i32, %c0_i32_0 : i32, i32
  }
  func.func @transform_3(%arg0: i32, %arg1: memref<2xi32, #tpu.memory_space<smem>>) -> (i32, i32, i32) {
    %c0_i32 = arith.constant 0 : i32
    %c0_i32_0 = arith.constant 0 : i32
    %c0_i32_1 = arith.constant 0 : i32
    return %arg0, %c0_i32, %c0_i32_0 : i32, i32, i32
  }
  func.func @transform_4(%arg0: i32, %arg1: memref<2xi32, #tpu.memory_space<smem>>) -> (i32, i32, i32) {
    %c0_i32 = arith.constant 0 : i32
    %c0_i32_0 = arith.constant 0 : i32
    %c0_i32_1 = arith.constant 0 : i32
    return %arg0, %c0_i32, %c0_i32_0 : i32, i32, i32
  }
}

</mosaic_0001>

<bundles_post_ra>
// kernel: _decompose_stacked.1
= control target key start
LH: loop header
LB: loop body
LE: loop exit
PB: predicated region body
PF: predicated region fallthrough
CT: control target
= control target key end

     0   :  { %s1848_s0 = inlined_call_operand.vmem [shape: s32[2], index: 0, kind: input, shape index: {}]   ;;  %s1849_s1 = inlined_call_operand.hbm [shape: f32[2,32,128], index: 1, kind: input, shape index: {}]   ;;  %s1850_s2 = inlined_call_operand.hbm [shape: f32[3,128,128], index: 2, kind: input, shape index: {}]   ;;  %s1851_s3 = inlined_call_operand.vmem [shape: f32[1,128], index: 3, kind: input, shape index: {}]   ;;  %s1852_s4 = inlined_call_operand.hbm [shape: f32[2,32,128], index: 4, kind: output, shape index: {0}]   ;;  %s1853_s5 = inlined_call_operand.hbm [shape: f32[2,32,128], index: 5, kind: output, shape index: {1}]  }
   0x1   :  { %s11_s20 = sshll.u32 %s1848_s0, 4  ;;  %s12_s20 = int_to_ptr.vmem [resolvable:$true] %s11_s20 }
   0x2   :  { %s1241_s21 = scalar_lea.vmem %s12_s20, 16  ;;  %p1246_p1 = scmp.lt.s32.totalorder %s12_s20, %s12_s20 }
   0x3   :  { %p1242_p0 = scmp.ne.s32.totalorder %s12_s20, %s1241_s21  ;;  %p1247_p2 = scmp.lt.s32.totalorder %s1241_s21, %s1241_s21 }
   0x5   :  { %p1248_p3 = por %p1247_p2, %p1246_p1 }
   0x7   :  { %p1249_p4 = pnand %p1248_p3, %p1242_p0 }
   0x9   :  { %1252 = shalt.err (!%p1249_p4)  }
   0xa   :  { %s1417_s22 = smov [#allocation3]  }
   0xb   :  { %14 = dma.vmem_to_smem %s12_s20, 16, %s1417_s22, [#allocation2] }
   0xc   :  { %1383 = dma.done.wait [#allocation2], 16 }
   0xd   :  { %1384 = vsyncadd [#allocation2], 4294967280 }
   0xe   :  { %16 = sfence }
   0xf   :  { %17 = vsyncpa [#allocation5], 0 }
  0x10   :  { %19 = vsyncpa [#allocation5 + $0x1], 0 }
  0x11   :  { %20 = vsyncpa [#allocation8], 0 }
  0x12   :  { %21 = vsyncpa [#allocation6], 0 }
  0x13   :  { %23 = vsyncpa [#allocation6 + $0x1], 0 }
  0x14   :  { %24 = vsyncpa [#allocation11], 0 }
  0x15   :  { %26 = vsyncpa [#allocation11 + $0x1], 0  ;;  %s1459_s0 = smov 0   ;;  %s1461_s23 = smov 0  }
  0x16   :  { %s1463_s24 = smov 0   ;;  %s1465_s25 = smov 0  }
  0x17 LB: > { %s1480_s26 = sadd.s32 4294967295, %s1415_s25   ;;  %s848_s27 = sadd.s32 4294967294, %s1415_s25   ;;  %s1415_s25 = sphi %s1465_s25, %s1881_s25   ;;  %s1411_s24 = sphi %s1463_s24, %s1880_s24   ;;  %s1407_s23 = sphi %s1461_s23, %s1879_s23   ;;  %s1403_s0 = sphi %s1459_s0, %s1878_s0  }
  0x18   : > { %p52_p5 = scmp.ne.s32.totalorder %s1407_s23, %s1403_s0  ;;  %p1854_p6 = scmp.eq.s32.totalorder %s1480_s26, 0 }
  0x19   : > { %p124_p8 = scmp.eq.s32.totalorder %s848_s27, 1  ;;  %p849_p10 = scmp.ge.s32.totalorder %s1415_s25, 1 }
  0x1a   : > { %p1489_p9 = por %p1854_p6, %p52_p5  ;;  %p157_p12 = scmp.lt.s32.totalorder %s1415_s25, 3 }
  0x1b   : > { %p1494_p11 = por %p124_p8, %p52_p5  ;;  %s1418_s6 = smov [#allocation7]  }
  0x1c   : > { %s1857_s28 = scalar_select %p1489_p9, 1, 0 }
  0x1d   : > { %s1858_s29 = scalar_select %p1494_p11, 1, 0 }
  0x1e   : > { %p1499_p13 = pnand %p849_p10, %p157_p12  ;;  %s169_s7 = sshll.u32 %s1418_s6, 4  ;;  %s1503_s7 = int_to_ptr.vmem [resolvable:$true] %s169_s7 }
  0x1f   : > { %s1515_s9 = sadd.s32 1, %s1415_s25   ;;  %s39_s10 = sadd.s32 1, %s1411_s24 }
  0x20   : > { %s1859_s30 = scalar_select %p1499_p13, 1, 0 }
  0x21   : > { %p1184_p0 = pneg %p1499_p13  ;;  %s36_s11 = ssub.s32 %s1415_s25, %s1515_s9 }
  0x22   : > { %s1253_s14 = scalar_lea.hbm %s1850_s2, 6144 }
  0x23   : > { %p1510_p2 = pnand %p1184_p0, %p1854_p6  ;;  %p1254_p3 = scmp.ne.s32.totalorder %s1850_s2, %s1253_s14 }
  0x24   : > { %p1260_p10 = scmp.lt.u32.totalorder %s1253_s14, %s1850_s2 }
  0x25   : > { %p1255_p4 = pneg %p1510_p2 }
  0x27   : > { %p1256_p5 = pnand %p1255_p4, %p1254_p3 }
  0x29   : > { %p1257_p8 = pneg %p1256_p5 }
  0x2b   : > { %p1262_p12 = pnand %p1260_p10, %p1257_p8 }
  0x2d   : > { %1265 = shalt.err (!%p1262_p12)
}
  0x2e   : > { %s1266_s19 = scalar_lea.vmem %s1503_s7, 6144  ;;  %p1274_p7 = scmp.lt.s32.totalorder %s1503_s7, %s1503_s7 }
  0x2f   : > { %p1267_p0 = scmp.ne.s32.totalorder %s1503_s7, %s1266_s19  ;;  %p1275_p11 = scmp.lt.s32.totalorder %s1266_s19, %s1266_s19 }
  0x31   : > { %p1269_p1 = pnand %p1267_p0, %p1255_p4  ;;  %p1276_p9 = por %p1275_p11, %p1274_p7 }
  0x33   : > { %p1270_p6 = pneg %p1269_p1 }
  0x35   : > { %p1277_p13 = pnand %p1276_p9, %p1270_p6 }
  0x37   : > { %1280 = shalt.err (!%p1277_p13)
}
  0x38   : > { %s1419_s20 = smov 128   ;;  %s1420_s21 = smov 8  }
  0x39   : > { %1187 = dma.hbm_to_vmem [thread:$0]  (!%p1510_p2), %s1850_s2, 6144, %s1503_s7, [#allocation8], %s1419_s20, %s1419_s20, %s1420_s21  }
  0x3a   : > { %p37_p6 = scmp.eq.s32.totalorder %s36_s11, 0  ;;  %p46_p7 = scmp.ne.s32.totalorder %s1411_s24, %s1407_s23 }
  0x3b   : > { %p47_p9 = scmp.eq.s32.totalorder %s1415_s25, 0  ;;  %p1200_p11 = scmp.lt.s32.totalorder %s1415_s25, 2 }
  0x3c   : > { %s1549_s6 = scalar_select %p37_p6, %s1411_s24, %s39_s10  }
  0x3d   : > { %p48_p13 = por %p47_p9, %p46_p7  ;;  %p1861_p1 = scmp.eq.s32.totalorder %s1480_s26, 1 }
  0x3e   : > { %s186_s8 = sand.u32 1, %s1411_s24   ;;  %s877_s13 = sshll.u32 %s1415_s25, 9 }
  0x3f   : > { %p1553_p3 = por %p1861_p1, %p46_p7  ;;  %s852_s14 = sshll.u32 %s186_s8, 5 }
  0x40   : > { %s1562_s17 = scalar_lea.hbm %s1849_s1, %s877_s13  ;;  %s190_s7 = scalar_lea.vmem [#allocation4], %s852_s14 }
  0x41   : > { %s197_s10 = sshll.u32 %s190_s7, 4  ;;  %p1564_p2 = pnand %p1200_p11, %p48_p13  ;;  %s1568_s10 = int_to_ptr.vmem [resolvable:$true] %s197_s10 }
  0x42   : > { %s1570_s18 = scalar_lea.sflag [#allocation5], %s186_s8  ;;  %s1281_s19 = scalar_lea.hbm %s1562_s17, 512 }
  0x43   : > { %p1282_p4 = scmp.ne.s32.totalorder %s1562_s17, %s1281_s19  ;;  %p1283_p5 = pneg %p1564_p2 }
  0x44   : > { %s1286_s13 = scalar_lea.hbm %s1849_s1, 1024  ;;  %p1287_p12 = scmp.lt.u32.totalorder %s1562_s17, %s1849_s1 }
  0x45   : > { %p1284_p8 = pnand %p1283_p5, %p1282_p4  ;;  %p1288_p0 = scmp.lt.u32.totalorder %s1286_s13, %s1281_s19 }
  0x46   : > { %p1290_p7 = scmp.lt.u32.totalorder %s1281_s19, %s1562_s17 }
  0x47   : > { %p1285_p10 = pneg %p1284_p8  ;;  %p1289_p6 = por %p1288_p0, %p1287_p12 }
  0x49   : > { %p1291_p9 = por %p1290_p7, %p1289_p6 }
  0x4b   : > { %p1292_p11 = pnand %p1291_p9, %p1285_p10 }
  0x4d   : > { %1295 = shalt.err (!%p1292_p11)
}
  0x4e   : > { %s1296_s8 = scalar_lea.vmem %s1568_s10, 512  ;;  %s1421_s16 = smov [#allocation4]  }
  0x4f   : > { %p1297_p13 = scmp.ne.s32.totalorder %s1568_s10, %s1296_s8  ;;  %s1301_s7 = sshll.u32 %s1421_s16, 4  ;;  %s1302_s7 = int_to_ptr.vmem [resolvable:$false] %s1301_s7 }
  0x50   : > { %s1303_s22 = scalar_lea.vmem %s1302_s7, 1024  ;;  %p1304_p8 = scmp.lt.s32.totalorder %s1568_s10, %s1302_s7 }
  0x51   : > { %p1299_p1 = pnand %p1297_p13, %p1283_p5  ;;  %p1305_p12 = scmp.lt.s32.totalorder %s1303_s22, %s1296_s8 }
  0x53   : > { %p1300_p4 = pneg %p1299_p1  ;;  %p1306_p0 = por %p1305_p12, %p1304_p8 }
  0x55   : > { %p1307_p6 = pnand %p1306_p0, %p1300_p4 }
  0x57   : > { %1310 = shalt.err (!%p1307_p6)
}
  0x58   : > { %1191 = dma.hbm_to_vmem [thread:$0]  (!%p1564_p2), %s1562_s17, 512, %s1568_s10, %s1570_s18, %s1419_s20, %s1419_s20, %s1420_s21  }
  0x59   : > { %p1864_p5 = scmp.ne.s32.totalorder %s1859_s30, 0 }
  0x5a   : > { %s1604_s19 = sand.u32 (!%p1864_p5), 1, %s1407_s23   ;;  %p1865_p10 = scmp.ne.s32.totalorder (!%p1864_p5), %s1857_s28, 0 }
  0x5b   : > { %209 = sbr.rel (%p1864_p5) target bundleno = 439 (0x1b7), region = 32  ;;  %s1607_s27 = sshll.u32 (!%p1864_p5), %s1604_s19, 5 }
  0x5c   : > { %s212_s11 = scalar_lea.sflag (!%p1864_p5), [#allocation5], %s1604_s19  ;;  %s1611_s13 = scalar_lea.vmem (!%p1864_p5), [#allocation4], %s1607_s27 }
  0x62   : > { %1386 = dma.done.wait (%p1865_p10), %s212_s11, 512  }
  0x63   : > { %1388 = vsyncadd (%p1865_p10), %s212_s11, 4294966784  ;;  %p1866_p2 = scmp.eq.s32.totalorder %s1480_s26, 0 }
  0x65   : > { %1390 = dma.done.wait (%p1866_p2), [#allocation8], 6144   ;;  %p1867_p7 = pmov %p1866_p2 }
  0x66   : > { %v254_v0 = vlaneseq  ;;  %v335_v1 = vld [vmem:[#allocation7] sm:$0xff]  ;;  %v336_v2 = vld [vmem:[#allocation7 + $0x8] sm:$0xff]  ;;  %v337_v6 = vld [vmem:[#allocation7 + $0x10] sm:$0xff]  ;;  %s249_s28 = sld [smem:[#allocation3 + %s1480_s26]]  ;;  %s878_s21 = sshll.u32 %s1480_s26, 9 }
  0x67   : > { %1392 = vsyncadd (%p1867_p7), [#allocation8], 4294961152  ;;  %v319_v3 = vld [vmem:[#allocation7 + $0x80] sm:$0xff]  ;;  %v1054_v4 = vpack.c.bf16 %v336_v2, %v335_v1  ;;  %v320_v5 = vld [vmem:[#allocation7 + $0x88] sm:$0xff]  ;;  %s1750_s17 = scalar_lea.vmem [#allocation9], %s1607_s27  ;;  %s248_s18 = scalar_lea.vmem [#allocation10], %s1607_s27 }
  0x68   : > { %v338_v7 = vld [vmem:[#allocation7 + $0x18] sm:$0xff]  ;;  %v1621_v8 = vshrl.u32 %v254_v0, 7  ;;  %v1086_v9 = vpack.c.bf16 %v320_v5, %v319_v3  ;;  %v321_v11 = vld [vmem:[#allocation7 + $0x90] sm:$0xff]  ;;  %v339_v13 = vld [vmem:[#allocation7 + $0x20] sm:$0xff]  ;;  %s717_s10 = sshll.u32 %s1750_s17, 4  ;;  %s733_s14 = sshll.u32 %s248_s18, 4  ;;  %s1759_s14 = int_to_ptr.vmem [resolvable:$true] %s733_s14  ;;  %s1770_s10 = int_to_ptr.vmem [resolvable:$true] %s717_s10 }
  0x69   : > { %v1058_v10 = vpack.c.bf16 %v338_v7, %v337_v6  ;;  %v322_v12 = vld [vmem:[#allocation7 + $0x98] sm:$0xff]  ;;  %1055 = vmatprep.subr.bf16.mxu1 %v1054_v4  ;;  %v340_v15 = vld [vmem:[#allocation7 + $0x28] sm:$0xff]  ;;  %v323_v16 = vld [vmem:[#allocation7 + $0xa0] sm:$0xff]  ;;  %s1757_s26 = scalar_lea.hbm %s1853_s5, %s878_s21  ;;  %s1768_s22 = scalar_lea.hbm %s1852_s4, %s878_s21 }
  0x6a   : > { %v1090_v14 = vpack.c.bf16 %v322_v12, %v321_v11  ;;  %v324_v17 = vld [vmem:[#allocation7 + $0xa8] sm:$0xff]  ;;  %1087 = vmatprep.subr.bf16.mxu0 %v1086_v9  ;;  %1057 = vmatpush3.bf16.msra.mxu1 %v1054_v4  ;;  %v1062_v18 = vpack.c.bf16 %v340_v15, %v339_v13  ;;  %v259_v19 = vand.u32 15, %v1621_v8  ;;  %v341_v21 = vld [vmem:[#allocation7 + $0x30] sm:$0xff]  ;;  %v342_v22 = vld [vmem:[#allocation7 + $0x38] sm:$0xff]  ;;  %vm280_vm1 = vcmp.lt.s32.totalorder %v1621_v8, 1  ;;  %s704_s27 = scalar_lea.sflag [#allocation11], %s1604_s19 }
  0x6b   : > { %1089 = vmatpush3.bf16.msra.mxu0 %v1086_v9  ;;  %1059 = vmatprep.subr.bf16.mxu1 %v1058_v10  ;;  %v1094_v20 = vpack.c.bf16 %v324_v17, %v323_v16  ;;  %v325_v23 = vld [vmem:[#allocation7 + $0xb0] sm:$0xff]  ;;  %v326_v24 = vld [vmem:[#allocation7 + $0xb8] sm:$0xff]  ;;  %v1066_v25 = vpack.c.bf16 %v342_v22, %v341_v21  ;;  %v343_v28 = vld [vmem:[#allocation7 + $0x40] sm:$0xff]  ;;  %v1647_v55 = vadd.s32 16, %v1621_v8  ;;  %vm301_vm5 = vcmp.lt.s32.totalorder %v1621_v8, 7  ;;  %s1311_s11 = scalar_lea.vmem %s1759_s14, 512 }
  0x6c   : > { %1091 = vmatprep.subr.bf16.mxu0 %v1090_v14  ;;  %vm1626_vm0 = vcmp.eq.s32.totalorder %v259_v19, 0  ;;  %v1098_v27 = vpack.c.bf16 %v326_v24, %v325_v23  ;;  %v344_v29 = vld [vmem:[#allocation7 + $0x48] sm:$0xff]  ;;  %v1631_v30 = vld [vmem:[%s1611_s13] sm:$0xff]  ;;  %v1634_v33 = vld [vmem:[%s1611_s13 + $0x18] sm:$0xff]  ;;  %p1312_p9 = scmp.ne.s32.totalorder %s1759_s14, %s1311_s11 }
  0x6d   : > { %v327_v31 = vld [vmem:[#allocation7 + $0xc0] sm:$0xff]  ;;  %v328_v32 = vld [vmem:[#allocation7 + $0xc8] sm:$0xff]  ;;  %v276_v34 = vrot.slane %v1631_v30, 7  ;;  %1010 = vmatprep.mubr.f32.mxu0 %v1631_v30  ;;  %v279_v35 = vrot.slane %v1634_v33, 7  ;;  %vm860_vm2 = vmneg %vm1626_vm0  ;;  %v1070_v36 = vpack.c.bf16 %v344_v29, %v343_v28  ;;  %v261_v63 = vand.u32 15, %v1647_v55 }
  0x6e   : > { %1061 = vmatpush3.bf16.msra.mxu1 %v1058_v10  ;;  %v1102_v37 = vpack.c.bf16 %v328_v32, %v327_v31  ;;  %v345_v38 = vld [vmem:[#allocation7 + $0x50] sm:$0xff]  ;;  %v346_v39 = vld [vmem:[#allocation7 + $0x58] sm:$0xff]  ;;  %v347_v45 = vld [vmem:[#allocation7 + $0x60] sm:$0xff]  ;;  %v297_v11 = vrot.slane %v1631_v30, 1  ;;  %v300_v15 = vrot.slane %v1634_v33, 1  ;;  %p1313_p11 = pnand %p1312_p9, %p1553_p3 }
  0x6f   : > { %1093 = vmatpush3.bf16.msra.mxu0 %v1090_v14  ;;  %1063 = vmatprep.subr.bf16.mxu1 %v1062_v18  ;;  %v284_v40 = vsel %vm280_vm1, %v279_v35, %v276_v34  ;;  %v329_v41 = vld [vmem:[#allocation7 + $0xd0] sm:$0xff]  ;;  %v330_v42 = vld [vmem:[#allocation7 + $0xd8] sm:$0xff]  ;;  %v1074_v43 = vpack.c.bf16 %v346_v39, %v345_v38  ;;  %v348_v46 = vld [vmem:[#allocation7 + $0x68] sm:$0xff]  ;;  %vm1662_vm3 = vcmp.eq.s32.totalorder %v261_v63, 0  ;;  %v256_v38 = vadd.s32 8, %v1621_v8 }
  0x70   : > { %1095 = vmatprep.subr.bf16.mxu0 %v1094_v20  ;;  %972 = vmatprep.mubr.msk.f32.mxu1 %vm860_vm2, %v284_v40  ;;  %v1106_v44 = vpack.c.bf16 %v330_v42, %v329_v41  ;;  %v331_v47 = vld [vmem:[#allocation7 + $0xe0] sm:$0xff]  ;;  %v332_v48 = vld [vmem:[#allocation7 + $0xe8] sm:$0xff]  ;;  %v1078_v49 = vpack.c.bf16 %v348_v46, %v347_v45  ;;  %v349_v51 = vld [vmem:[#allocation7 + $0x70] sm:$0xff]  ;;  %p1314_p13 = pneg %p1313_p11 }
  0x71   : > { %v1110_v50 = vpack.c.bf16 %v332_v48, %v331_v47  ;;  %v350_v52 = vld [vmem:[#allocation7 + $0x78] sm:$0xff]  ;;  %v333_v53 = vld [vmem:[#allocation7 + $0xf0] sm:$0xff]  ;;  %v1650_v57 = vld [vmem:[%s1611_s13 + $0x8] sm:$0xff]  ;;  %v260_v41 = vand.u32 15, %v256_v38 }
  0x72   : > { %1065 = vmatpush3.bf16.msra.mxu1 %v1062_v18  ;;  %v334_v54 = vld [vmem:[#allocation7 + $0xf8] sm:$0xff]  ;;  %v1082_v56 = vpack.c.bf16 %v350_v52, %v349_v51  ;;  %v522_v59 = vld [vmem:[#allocation7 + $0x100] sm:$0xff]  ;;  %v523_v60 = vld [vmem:[#allocation7 + $0x108] sm:$0xff]  ;;  %v277_v61 = vrot.slane %v1650_v57, 7  ;;  %v298_v12 = vrot.slane %v1650_v57, 1 }
  0x73   : > { %1097 = vmatpush3.bf16.msra.mxu0 %v1094_v20  ;;  %1067 = vmatprep.subr.bf16.mxu1 %v1066_v25  ;;  %v1114_v58 = vpack.c.bf16 %v334_v54, %v333_v53  ;;  %v1654_v62 = vld [vmem:[%s1611_s13 + $0x10] sm:$0xff]  ;;  %v1118_v0 = vpack.c.bf16 %v523_v60, %v522_v59  ;;  %v525_v2 = vld [vmem:[#allocation7 + $0x118] sm:$0xff]  ;;  %v526_v7 = vld [vmem:[#allocation7 + $0x120] sm:$0xff]  ;;  %vm1698_vm7 = vcmp.eq.s32.totalorder %v260_v41, 15  ;;  %v271_v54 = vstv %s249_s28  ;;  %s1422_s13 = smov [#allocation10]  }
  0x74   : > { %1099 = vmatprep.subr.bf16.mxu0 %v1098_v27  ;;  %v524_v1 = vld [vmem:[#allocation7 + $0x110] sm:$0xff]  ;;  %v278_v3 = vrot.slane %v1654_v62, 7  ;;  %v283_v4 = vsel %vm280_vm1, %v276_v34, %v277_v61  ;;  %v527_v9 = vld [vmem:[#allocation7 + $0x128] sm:$0xff]  ;;  %vm862_vm4 = vmneg %vm1662_vm3  ;;  %v299_v14 = vrot.slane %v1654_v62, 1  ;;  %v304_v20 = vsel %vm301_vm5, %v297_v11, %v298_v12  ;;  %s1315_s28 = sshll.u32 %s1422_s13, 4  ;;  %s1316_s28 = int_to_ptr.vmem [resolvable:$false] %s1315_s28 }
  0x75   : > { %v1122_v6 = vpack.c.bf16 %v525_v2, %v524_v1  ;;  %v1126_v16 = vpack.c.bf16 %v527_v9, %v526_v7  ;;  %v528_v17 = vld [vmem:[#allocation7 + $0x130] sm:$0xff]  ;;  %v529_v18 = vld [vmem:[#allocation7 + $0x138] sm:$0xff]  ;;  %v530_v23 = vld [vmem:[#allocation7 + $0x140] sm:$0xff]  ;;  %vm273_vm11 = vcmp.lt.s32.totalorder %v260_v41, %v271_v54  ;;  %vm274_vm12 = vcmp.lt.s32.totalorder %v261_v63, %v271_v54  ;;  %s1317_s30 = scalar_lea.vmem %s1316_s28, 1024  ;;  %p1318_p1 = scmp.lt.s32.totalorder %s1759_s14, %s1316_s28 }
  0x76   : > { %1069 = vmatpush3.bf16.msra.mxu1 %v1066_v25  ;;  %v282_v10 = vsel %vm280_vm1, %v277_v61, %v278_v3  ;;  %v281_v13 = vsel %vm280_vm1, %v278_v3, %v279_v35  ;;  %v302_v21 = vsel %vm301_vm5, %v299_v14, %v300_v15  ;;  %v1130_v22 = vpack.c.bf16 %v529_v18, %v528_v17  ;;  %v531_v24 = vld [vmem:[#allocation7 + $0x148] sm:$0xff]  ;;  %v533_v28 = vld [vmem:[#allocation7 + $0x158] sm:$0xff]  ;;  %v534_v31 = vld [vmem:[#allocation7 + $0x160] sm:$0xff]  ;;  %p1319_p4 = scmp.lt.s32.totalorder %s1317_s30, %s1311_s11 }
  0x77   : > { %1101 = vmatpush3.bf16.msra.mxu0 %v1098_v27  ;;  %1071 = vmatprep.subr.bf16.mxu1 %v1070_v36  ;;  %v1134_v25 = vpack.c.bf16 %v531_v24, %v530_v23  ;;  %v532_v27 = vld [vmem:[#allocation7 + $0x150] sm:$0xff]  ;;  %v535_v32 = vld [vmem:[#allocation7 + $0x168] sm:$0xff]  ;;  %v258_v35 = vadd.s32 24, %v1621_v8  ;;  %v303_v45 = vsel %vm301_vm5, %v298_v12, %v299_v14  ;;  %vm864_vm9 = vmneg %vm1698_vm7  ;;  %vm272_vm13 = vcmp.lt.s32.totalorder %v259_v19, %v271_v54 }
  0x78   : > { %1103 = vmatprep.subr.bf16.mxu0 %v1102_v37  ;;  %v1138_v29 = vpack.c.bf16 %v533_v28, %v532_v27  ;;  %v1142_v34 = vpack.c.bf16 %v535_v32, %v534_v31  ;;  %p1320_p8 = por %p1319_p4, %p1318_p1 }
  0x79   : > { %v262_v40 = vand.u32 15, %v258_v35 }
  0x7a   : > { %1073 = vmatpush3.bf16.msra.mxu1 %v1070_v36  ;;  %v536_v36 = vld [vmem:[#allocation7 + $0x170] sm:$0xff]  ;;  %p1321_p12 = pnand %p1320_p8, %p1314_p13 }
  0x7b   : > { %1105 = vmatpush3.bf16.msra.mxu0 %v1102_v37  ;;  %1075 = vmatprep.subr.bf16.mxu1 %v1074_v43  ;;  %v537_v37 = vld [vmem:[#allocation7 + $0x178] sm:$0xff]  ;;  %vm1694_vm6 = vcmp.eq.s32.totalorder %v262_v40, 15  ;;  %vm275_vm10 = vcmp.lt.s32.totalorder %v262_v40, %v271_v54 }
  0x7c   : > { %1107 = vmatprep.subr.bf16.mxu0 %v1106_v44  ;;  %v1146_v39 = vpack.c.bf16 %v537_v37, %v536_v36  ;;  %vm866_vm8 = vmneg %vm1694_vm6 }
  0x7e   : > { %1077 = vmatpush3.bf16.msra.mxu1 %v1074_v43 }
  0x7f   : > { %1109 = vmatpush3.bf16.msra.mxu0 %v1106_v44  ;;  %1079 = vmatprep.subr.bf16.mxu1 %v1078_v49  ;;  %v305_v44 = vsel %vm301_vm5, %v300_v15, %v297_v11 }
  0x80   : > { %1111 = vmatprep.subr.bf16.mxu0 %v1110_v50 }
  0x82   : > { %1081 = vmatpush3.bf16.msra.mxu1 %v1078_v49 }
  0x83   : > { %1113 = vmatpush3.bf16.msra.mxu0 %v1110_v50  ;;  %1083 = vmatprep.subr.bf16.mxu1 %v1082_v56 }
  0x84   : > { %1115 = vmatprep.subr.bf16.mxu0 %v1114_v58 }
  0x86   : > { %1085 = vmatpush3.bf16.msra.mxu1 %v1082_v56  ;;  %v868_v56 = vld [vmem:[%s1851_s3] ss:$0 sm:$0xff] }
  0x87   : > { %1117 = vmatpush3.bf16.msra.mxu0 %v1114_v58  ;;  %1150 = vmatprep.subr.bf16.mxu1 %v1118_v0 }
  0x88   : > { %1119 = vmatprep.subr.bf16.mxu0 %v1118_v0 }
  0x89   : > { %973 = vmatmul.mubr.f32.vlgmr.msra.gmra.mrb[0].mxu1 %v283_v4 }
  0x8a   : > { %1011 = vmatmul.mubr.f32.vlgmr.msra.gmra.mrb[0].mxu0 %v1650_v57  ;;  %1158 = vmatpush3.bf16.msra.mxu1 %v1118_v0 }
  0x8b   : > { %1121 = vmatpush3.bf16.msra.mxu0 %v1118_v0  ;;  %1151 = vmatprep.subr.bf16.mxu1 %v1122_v6 }
  0x8c   : > { %1123 = vmatprep.subr.bf16.mxu0 %v1122_v6  ;;  %975 = vmatprep.mubr.msk.f32.mxu1 %vm862_vm4, %v282_v10 }
  0x8d   : > { %1013 = vmatprep.mubr.f32.mxu0 %v1654_v62  ;;  %976 = vmatmul.mubr.f32.gmra.mrb[2].mxu1 %v281_v13 }
  0x8e   : > { %1159 = vmatpush3.bf16.msra.mxu1 %v1122_v6  ;;  %1014 = vmatmul.mubr.f32.gmra.mrb[2].mxu0 %v1634_v33 }
  0x8f   : > { %1125 = vmatpush3.bf16.msra.mxu0 %v1122_v6  ;;  %1152 = vmatprep.subr.bf16.mxu1 %v1126_v16 }
  0x90   : > { %1127 = vmatprep.subr.bf16.mxu0 %v1126_v16  ;;  %1048 = vmatprep.mubr.f32.mxu0 %v304_v20 }
  0x91   : > { %1051 = vmatprep.mubr.f32.mxu1 %v302_v21 }
  0x92   : > { %1160 = vmatpush3.bf16.msra.mxu1 %v1126_v16 }
  0x93   : > { %1129 = vmatpush3.bf16.msra.mxu0 %v1126_v16  ;;  %1153 = vmatprep.subr.bf16.mxu1 %v1130_v22 }
  0x94   : > { %1131 = vmatprep.subr.bf16.mxu0 %v1130_v22 }
  0x96   : > { %1161 = vmatpush3.bf16.msra.mxu1 %v1130_v22 }
  0x97   : > { %1133 = vmatpush3.bf16.msra.mxu0 %v1130_v22  ;;  %1154 = vmatprep.subr.bf16.mxu1 %v1134_v25 }
  0x98   : > { %1135 = vmatprep.subr.bf16.mxu0 %v1134_v25 }
  0x9a   : > { %1162 = vmatpush3.bf16.msra.mxu1 %v1134_v25 }
  0x9b   : > { %1137 = vmatpush3.bf16.msra.mxu0 %v1134_v25  ;;  %1155 = vmatprep.subr.bf16.mxu1 %v1138_v29 }
  0x9c   : > { %1139 = vmatprep.subr.bf16.mxu0 %v1138_v29 }
  0x9e   : > { %1163 = vmatpush3.bf16.msra.mxu1 %v1138_v29 }
  0x9f   : > { %1141 = vmatpush3.bf16.msra.mxu0 %v1138_v29  ;;  %1156 = vmatprep.subr.bf16.mxu1 %v1142_v34 }
  0xa0   : > { %1143 = vmatprep.subr.bf16.mxu0 %v1142_v34 }
  0xa2   : > { %1164 = vmatpush3.bf16.msra.mxu1 %v1142_v34 }
  0xa3   : > { %1145 = vmatpush3.bf16.msra.mxu0 %v1142_v34  ;;  %1157 = vmatprep.subr.bf16.mxu1 %v1146_v39 }
  0xa4   : > { %1147 = vmatprep.subr.bf16.mxu0 %v1146_v39 }
  0xa6   : > { %1165 = vmatpush3.bf16.msra.mxu1 %v1146_v39 }
  0xa7   : > { %1149 = vmatpush3.bf16.msra.mxu0 %v1146_v39 }
  0xa9   : > { %1052 = vmatmul.mubr.msk.f32.vlgmr.msra.gmra.mrb[4].mxu1 %vm866_vm8, %v305_v44 }
  0xaa   : > { %1049 = vmatmul.mubr.msk.f32.vlgmr.msra.gmra.mrb[0].mxu0 %vm864_vm9, %v303_v45 }
 0x15c   : > { %v974_v46 = vpop.f32.mrb[0].mxu1 }
 0x15d   : > { %v417_v47 = vpop.f32.mrb[1].mxu1 }
 0x160   : > { %v977_v48 = vpop.f32.mrb[2].mxu1 }
 0x161   : > { %v1015_v49 = vpop.f32.mrb[2].mxu0  ;;  %v427_v50 = vpop.f32.mrb[3].mxu1 }
 0x162   : > { %v518_v51 = vadd.f32 %v1015_v49, %v977_v48  ;;  %v512_v52 = vpop.f32.mrb[3].mxu0 }
 0x163   : > { %v513_v53 = vadd.f32 %v512_v52, %v427_v50 }
 0x17c   : > { %v1053_v58 = vpop.f32.mrb[4].mxu1 }
 0x17d   : > { %v1050_v59 = vpop.f32.mrb[0].mxu0  ;;  %v626_v60 = vadd.f32 %v1053_v58, %v518_v51  ;;  %v614_v61 = vpop.f32.mrb[5].mxu1 }
 0x17e   : > { %v1166_v0 = vadd.f32 %v1050_v59, %v974_v46  ;;  %v604_v1 = vpop.f32.mrb[1].mxu0  ;;  %v625_v2 = vadd.f32 %v614_v61, %v513_v53 }
 0x17f   : > { %v637_v3 = vadd.f32 %v868_v56, %v626_v60  ;;  %v1167_v4 = vadd.f32 %v604_v1, %v417_v47 }
 0x180   : > { %v635_v6 = vadd.f32 %v1166_v0, %v868_v56  ;;  %v636_v7 = vadd.f32 %v868_v56, %v625_v2 }
 0x181   : > { %v649_v9 = vsel %vm275_vm10, %v637_v3, 0.0  ;;  %v634_v10 = vadd.f32 %v1167_v4, %v868_v56 }
 0x182   : > { %v647_v11 = vsel %vm273_vm11, %v635_v6, 0.0  ;;  %v653_v12 = vrot.slane %v649_v9, 7  ;;  %v665_v13 = vrot.slane %v649_v9, 1  ;;  %v648_v14 = vsel %vm274_vm12, %v636_v7, 0.0 }
 0x183   : > { %v651_v15 = vrot.slane %v647_v11, 7  ;;  %v663_v16 = vrot.slane %v647_v11, 1  ;;  %v646_v17 = vsel %vm272_vm13, %v634_v10, 0.0  ;;  %v652_v18 = vrot.slane %v648_v14, 7 }
 0x184   : > { %v650_v20 = vrot.slane %v646_v17, 7  ;;  %v662_v21 = vrot.slane %v646_v17, 1  ;;  %v664_v22 = vrot.slane %v648_v14, 1 }
 0x185   : > { %v654_v55 = vsel %vm280_vm1, %v652_v18, %v653_v12  ;;  %v655_v19 = vsel %vm280_vm1, %v651_v15, %v652_v18 }
 0x186   : > { %v656_v63 = vsel %vm280_vm1, %v650_v20, %v651_v15  ;;  %v657_v23 = vsel %vm280_vm1, %v653_v12, %v650_v20  ;;  %v668_v24 = vsel %vm301_vm5, %v662_v21, %v663_v16  ;;  %v669_v25 = vsel %vm301_vm5, %v665_v13, %v662_v21 }
 0x187   : > { %v658_v27 = vsel %vm1626_vm0, 0.0, %v657_v23  ;;  %v673_v28 = vsel %vm1694_vm6, 0.0, %v669_v25  ;;  %v675_v29 = vadd.f32 %v656_v63, %v647_v11  ;;  %v660_v31 = vsel %vm1662_vm3, 0.0, %v655_v19 }
 0x188   : > { %v674_v32 = vadd.f32 %v658_v27, %v646_v17  ;;  %v666_v34 = vsel %vm301_vm5, %v664_v22, %v665_v13  ;;  %v667_v35 = vsel %vm301_vm5, %v663_v16, %v664_v22  ;;  %v676_v36 = vadd.f32 %v660_v31, %v648_v14 }
 0x189   : > { %v671_v26 = vsel %vm1698_vm7, 0.0, %v667_v35  ;;  %v677_v37 = vadd.f32 %v654_v55, %v649_v9 }
 0x18a   : > { %v678_v38 = vadd.f32 %v674_v32, %v668_v24  ;;  %v679_v5 = vadd.f32 %v675_v29, %v671_v26  ;;  %v680_v39 = vadd.f32 %v676_v36, %v666_v34 }
 0x18b   : > { %v681_v40 = vadd.f32 %v677_v37, %v673_v28 }
 0x18c   : > { %v682_v41 = vmul.f32 0.33333334, %v678_v38  ;;  %v683_v8 = vmul.f32 0.33333334, %v679_v5  ;;  %v684_v42 = vmul.f32 0.33333334, %v680_v39 }
 0x18d   : > { %v685_v43 = vmul.f32 0.33333334, %v681_v40 }
 0x18e   : > { %v686_v44 = vsub.f32 %v1631_v30, %v682_v41  ;;  %694 = vst [vmem:[%s248_s18] sm:$0xff] %v682_v41  ;;  %v687_v45 = vsub.f32 %v1650_v57, %v683_v8  ;;  %v688_v46 = vsub.f32 %v1654_v62, %v684_v42  ;;  %695 = vst [vmem:[%s248_s18 + $0x8] sm:$0xff] %v683_v8 }
 0x18f   : > { %696 = vst [vmem:[%s248_s18 + $0x10] sm:$0xff] %v684_v42  ;;  %v689_v47 = vsub.f32 %v1634_v33, %v685_v43  ;;  %697 = vst [vmem:[%s248_s18 + $0x18] sm:$0xff] %v685_v43 }
 0x190   : > { %690 = vst [vmem:[%s1750_s17] sm:$0xff] %v686_v44  ;;  %691 = vst [vmem:[%s1750_s17 + $0x8] sm:$0xff] %v687_v45 }
 0x191   : > { %692 = vst [vmem:[%s1750_s17 + $0x10] sm:$0xff] %v688_v46 }
 0x192   : > { %1324 = shalt.err (!%p1321_p12)
}
 0x193   : > { %s1325_s20 = scalar_lea.hbm %s1757_s26, 512  ;;  %s1329_s15 = scalar_lea.hbm %s1853_s5, 1024 }
 0x194   : > { %p1326_p0 = scmp.ne.s32.totalorder %s1757_s26, %s1325_s20  ;;  %p1330_p10 = scmp.lt.u32.totalorder %s1757_s26, %s1853_s5 }
 0x195   : > { %p1331_p2 = scmp.lt.u32.totalorder %s1329_s15, %s1325_s20  ;;  %p1333_p9 = scmp.lt.u32.totalorder %s1325_s20, %s1757_s26 }
 0x196   : > { %p1327_p6 = pnand %p1326_p0, %p1553_p3 }
 0x197   : > { %p1332_p7 = por %p1331_p2, %p1330_p10 }
 0x198   : > { %p1328_p5 = pneg %p1327_p6 }
 0x199   : > { %p1334_p11 = por %p1333_p9, %p1332_p7 }
 0x19b   : > { %p1335_p13 = pnand %p1334_p11, %p1328_p5 }
 0x19d   : > { %1338 = shalt.err (!%p1335_p13)
}
 0x19e   : > { %s1423_s7 = smov 128   ;;  %s1424_s11 = smov 8   ;;  %693 = vst [vmem:[%s1750_s17 + $0x18] sm:$0xff] %v689_v47 }
 0x19f   : > { %1181 = dma.vmem_to_hbm [thread:$0]  (%p1553_p3), %s1759_s14, 512, %s1757_s26, %s704_s27, %s1423_s7, %s1423_s7, %s1424_s11  }
 0x1a0   : > { %s699_s13 = scalar_lea.sflag [#allocation6], %s1604_s19  ;;  %s1339_s28 = scalar_lea.vmem %s1770_s10, 512 }
 0x1a1   : > { %p1340_p1 = scmp.ne.s32.totalorder %s1770_s10, %s1339_s28  ;;  %s1425_s30 = smov [#allocation9]  }
 0x1a2   : > { %s1343_s20 = sshll.u32 %s1425_s30, 4  ;;  %s1344_s20 = int_to_ptr.vmem [resolvable:$false] %s1343_s20 }
 0x1a3   : > { %p1341_p4 = pnand %p1340_p1, %p1553_p3  ;;  %s1345_s21 = scalar_lea.vmem %s1344_s20, 1024 }
 0x1a4   : > { %p1346_p12 = scmp.lt.s32.totalorder %s1770_s10, %s1344_s20  ;;  %p1347_p0 = scmp.lt.s32.totalorder %s1345_s21, %s1339_s28 }
 0x1a5   : > { %p1342_p8 = pneg %p1341_p4 }
 0x1a6   : > { %p1348_p6 = por %p1347_p0, %p1346_p12 }
 0x1a8   : > { %p1349_p5 = pnand %p1348_p6, %p1342_p8 }
 0x1aa   : > { %1352 = shalt.err (!%p1349_p5)
}
 0x1ab   : > { %s1353_s17 = scalar_lea.hbm %s1768_s22, 512  ;;  %s1357_s27 = scalar_lea.hbm %s1852_s4, 1024 }
 0x1ac   : > { %p1354_p10 = scmp.ne.s32.totalorder %s1768_s22, %s1353_s17  ;;  %p1358_p9 = scmp.lt.u32.totalorder %s1768_s22, %s1852_s4 }
 0x1ad   : > { %p1359_p11 = scmp.lt.u32.totalorder %s1357_s27, %s1353_s17  ;;  %p1361_p1 = scmp.lt.u32.totalorder %s1353_s17, %s1768_s22 }
 0x1ae   : > { %p1355_p2 = pnand %p1354_p10, %p1553_p3 }
 0x1af   : > { %p1360_p13 = por %p1359_p11, %p1358_p9 }
 0x1b0   : > { %p1356_p7 = pneg %p1355_p2 }
 0x1b1   : > { %p1362_p4 = por %p1361_p1, %p1360_p13 }
 0x1b3   : > { %p1363_p8 = pnand %p1362_p4, %p1356_p7 }
 0x1b5   : > { %1366 = shalt.err (!%p1363_p8)
}
 0x1b6   : > { %1180 = dma.vmem_to_hbm [thread:$0]  (%p1553_p3), %s1770_s10, 512, %s1768_s22, %s699_s13, %s1423_s7, %s1423_s7, %s1424_s11  }
 0x1b7 PF: > { %s748_s8 = sand.u32 1, %s1403_s0   ;;  %p1876_p12 = scmp.ne.s32.totalorder %s1858_s29, 0 }
 0x1b8   : > { %p1877_p0 = scmp.ge.s32.totalorder %s1415_s25, 2  ;;  %s749_s16 = scalar_lea.sflag [#allocation6], %s748_s8 }
 0x1ba   : > { %p1193_p6 = pnand %p1877_p0, %p1876_p12 }
 0x1bc   : > { %1394 = dma.done.wait (!%p1193_p6), %s749_s16, 512  }
 0x1bd   : > { %1396 = vsyncadd (!%p1193_p6), %s749_s16, 4294966784  ;;  %s758_s12 = scalar_lea.sflag [#allocation11], %s748_s8 }
 0x1be   : > { %1398 = dma.done.wait (!%p1193_p6), %s758_s12, 512  }
 0x1bf   : > { %1400 = vsyncadd (!%p1193_p6), %s758_s12, 4294966784  ;;  %p29_p3 = scmp.ge.s32.totalorder %s1515_s9, 4   ;;  %s1878_s0 = smov %s1407_s23 }
 0x1c0   : > { %s1879_s23 = smov %s1411_s24  ;;  %s1880_s24 = smov %s1549_s6 }
 0x1c1   : > { %s1881_s25 = smov %s1515_s9  ;;  %31 = sbr.rel (!%p29_p3) target bundleno = 23 (0x17), region = 100 }
 0x1c8   :  { %763 = vsyncpa [#allocation5], 1 }
 0x1c9   :  { %765 = vsyncpa [#allocation5 + $0x1], 1 }
 0x1ca   :  { %766 = vsyncpa [#allocation8], 1 }
 0x1cb   :  { %767 = vsyncpa [#allocation6], 1 }
 0x1cc   :  { %769 = vsyncpa [#allocation6 + $0x1], 1 }
 0x1cd   :  { %770 = vsyncpa [#allocation11], 1 }
 0x1ce   :  { %772 = vsyncpa [#allocation11 + $0x1], 1 }

</bundles_post_ra>
